<compile_context>
chip_gen: v6e
topology: v6e:2x2x1
jax: 0.10.0
libtpu: 0.0.40
codegen_flags: <defaults>
</compile_context>

<pallas_src>
import functools

import jax
import jax.numpy as jnp
from jax.experimental import pallas as pl
from jax.experimental.pallas import tpu as pltpu

NEG_SLOPE = 0.01      # F.leaky_relu default negative_slope
LANE = 128            # TPU lane width


def fused_linear_leakyrelu_kernel(wb_ref, x_ref, o_ref):
    """wb_ref: SMEM (3,) = [w0, w1, b]; x_ref: VMEM (2, TB); o_ref: VMEM (1, TB)."""
    w0 = wb_ref[0]
    w1 = wb_ref[1]
    b = wb_ref[2]
    x = x_ref[...]                                    # (2, TB), lane-dense
    y = x[0:1, :] * w0 + x[1:2, :] * w1 + b           # (1, TB), pure VPU
    o_ref[...] = jnp.where(y >= 0, y, NEG_SLOPE * y).astype(o_ref.dtype)


@functools.partial(jax.jit, static_argnames=("block_b",))
def simple_nn_forward(x, w1, b1, w2, b2, *, block_b=2048):
    """x: (B, 2) f32; w1: (3, 2); b1: (3,); w2: (1, 3); b2: (1,)  (PyTorch layout)."""
    B = x.shape[0]

    # --- Algebraic fusion of the two bias-linears (no nonlinearity between) ---
    #   h = x @ w1.T + b1 ; y = h @ w2.T + b2
    #   => y = x @ (w1.T @ w2.T) + (b1 @ w2.T + b2)
    w_fused = (w1.T @ w2.T).reshape(2)                # (2,)
    b_fused = (b1 @ w2.T + b2).reshape(1)             # (1,)
    wb = jnp.concatenate([w_fused, b_fused]).astype(jnp.float32)   # (3,) -> SMEM

    # --- Lane-dense layout: batch on the 128-lane axis ---
    x_t = x.astype(jnp.float32).T                     # (2, B)
    b_pad = ((B + LANE - 1) // LANE) * LANE
    tb = min(block_b, b_pad)
    tb = ((tb + LANE - 1) // LANE) * LANE             # block = multiple of 128 lanes
    b_pad = ((b_pad + tb - 1) // tb) * tb             # padded B = multiple of block
    if b_pad != B:
        x_t = jnp.pad(x_t, ((0, 0), (0, b_pad - B)))

    out = pl.pallas_call(
        fused_linear_leakyrelu_kernel,
        out_shape=jax.ShapeDtypeStruct((1, b_pad), x.dtype),
        grid_spec=pltpu.PrefetchScalarGridSpec(
            num_scalar_prefetch=0,
            grid=(b_pad // tb,),
            in_specs=[
                pl.BlockSpec(memory_space=pltpu.MemorySpace.SMEM),  # fused [w0,w1,b]
                pl.BlockSpec((2, tb), lambda i: (0, i)),            # x, lane-dense
            ],
            out_specs=pl.BlockSpec((1, tb), lambda i: (0, i)),
        ),
        compiler_params=pltpu.CompilerParams(
            dimension_semantics=("parallel",)),
    )(wb, x_t)

    return out[0, :B].reshape(B, 1)


def reference_forward(x, w1, b1, w2, b2):
    h = x @ w1.T + b1
    y = h @ w2.T + b2
    return jnp.where(y >= 0, y, NEG_SLOPE * y)


if __name__ == "__main__":
    key = jax.random.PRNGKey(0)
    k_x, k_w1, k_b1, k_w2, k_b2 = jax.random.split(key, 5)

    # Small batch, not a multiple of 128 -> exercises padding and a 2-step grid.
    B = 200
    x = jax.random.normal(k_x, (B, 2), dtype=jnp.float32)

    # Deterministic init mimicking nn.Linear's U(-1/sqrt(fan_in), 1/sqrt(fan_in)).
    bound1 = 1.0 / jnp.sqrt(2.0)
    w1 = jax.random.uniform(k_w1, (3, 2), jnp.float32, -bound1, bound1)
    b1 = jax.random.uniform(k_b1, (3,), jnp.float32, -bound1, bound1)
    bound2 = 1.0 / jnp.sqrt(3.0)
    w2 = jax.random.uniform(k_w2, (1, 3), jnp.float32, -bound2, bound2)
    b2 = jax.random.uniform(k_b2, (1,), jnp.float32, -bound2, bound2)

    out = simple_nn_forward(x, w1, b1, w2, b2, block_b=128)   # 2 grid steps
    out = jax.block_until_ready(out)

    ref = reference_forward(x, w1, b1, w2, b2)
    assert out.shape == (B, 1), out.shape
    # Fusion reorders fp accumulation slightly; stays well within tolerance.
    assert jnp.allclose(out, ref, atol=1e-5, rtol=1e-5), (out, ref)

    print("KERNEL_OK")
</pallas_src>

<mosaic_0001>
module attributes {stable_mosaic.version = 11 : i64} {
  func.func @fused_linear_leakyrelu_kernel(%arg0: i32, %arg1: memref<3xf32, #tpu.memory_space<smem>>, %arg2: memref<2x128xf32, #tpu.memory_space<vmem>>, %arg3: memref<1x128xf32, #tpu.memory_space<vmem>>) attributes {dimension_semantics = [#tpu.dimension_semantics<parallel>], iteration_bounds = array<i64: 2>, scalar_prefetch = 0 : i64, scratch_operands = 0 : i64, tpu.core_type = #tpu.core_type<tc>, window_params = [{transform_indices = @transform_0, window_bounds = array<i64: 3>}, {transform_indices = @transform_1, window_bounds = array<i64: 2, 128>}, {transform_indices = @transform_2, window_bounds = array<i64: 1, 128>}]} {
    %c0 = arith.constant 0 : index
    %0 = memref.load %arg1[%c0] : memref<3xf32, #tpu.memory_space<smem>>
    %c1 = arith.constant 1 : index
    %1 = memref.load %arg1[%c1] : memref<3xf32, #tpu.memory_space<smem>>
    %c2 = arith.constant 2 : index
    %2 = memref.load %arg1[%c2] : memref<3xf32, #tpu.memory_space<smem>>
    %c0_0 = arith.constant 0 : index
    %c0_1 = arith.constant 0 : index
    %3 = vector.load %arg2[%c0_0, %c0_1] : memref<2x128xf32, #tpu.memory_space<vmem>>, vector<2x128xf32>
    %4 = vector.extract_strided_slice %3 {offsets = [0, 0], sizes = [1, 128], strides = [1, 1]} : vector<2x128xf32> to vector<1x128xf32>
    %5 = vector.broadcast %0 : f32 to vector<1x128xf32>
    %6 = arith.mulf %4, %5 : vector<1x128xf32>
    %7 = vector.extract_strided_slice %3 {offsets = [1, 0], sizes = [1, 128], strides = [1, 1]} : vector<2x128xf32> to vector<1x128xf32>
    %8 = vector.broadcast %1 : f32 to vector<1x128xf32>
    %9 = arith.mulf %7, %8 : vector<1x128xf32>
    %10 = arith.addf %6, %9 : vector<1x128xf32>
    %11 = vector.broadcast %2 : f32 to vector<1x128xf32>
    %12 = arith.addf %10, %11 : vector<1x128xf32>
    %cst = arith.constant 0.000000e+00 : f32
    %13 = vector.broadcast %cst : f32 to vector<1x128xf32>
    %14 = arith.cmpf oge, %12, %13 : vector<1x128xf32>
    %cst_2 = arith.constant 0.00999999977 : f32
    %15 = vector.broadcast %cst_2 : f32 to vector<1x128xf32>
    %16 = arith.mulf %15, %12 : vector<1x128xf32>
    %17 = arith.select %14, %12, %16 : vector<1x128xi1>, vector<1x128xf32>
    %c0_3 = arith.constant 0 : index
    %c0_4 = arith.constant 0 : index
    %18 = vector.load %arg3[%c0_3, %c0_4] : memref<1x128xf32, #tpu.memory_space<vmem>>, vector<1x128xf32>
    tpu.vector_store %arg3[%c0_3, %c0_4], %17 {strides = array<i32>} : memref<1x128xf32, #tpu.memory_space<vmem>>, vector<1x128xf32>,
    return
  }
  func.func @transform_0(%arg0: i32) -> i32 {
    %c0_i32 = arith.constant 0 : i32
    %c0_i32_0 = arith.constant 0 : i32
    return %c0_i32 : i32
  }
  func.func @transform_1(%arg0: i32) -> (i32, i32) {
    %c0_i32 = arith.constant 0 : i32
    %c0_i32_0 = arith.constant 0 : i32
    return %c0_i32, %arg0 : i32, i32
  }
  func.func @transform_2(%arg0: i32) -> (i32, i32) {
    %c0_i32 = arith.constant 0 : i32
    %c0_i32_0 = arith.constant 0 : i32
    return %c0_i32, %arg0 : i32, i32
  }
}

</mosaic_0001>

<bundles_post_ra>
// kernel: simple_nn_forward.1
= control target key start
LH: loop header
LB: loop body
LE: loop exit
PB: predicated region body
PF: predicated region fallthrough
CT: control target
= control target key end

     0   :  { %7 = vsyncpa [#allocation3], 0  ;;  %s302_s9 = smov 0   ;;  %s333_s0 = inlined_call_operand.vmem [shape: f32[3], index: 0, kind: input, shape index: {}]   ;;  %s334_s1 = inlined_call_operand.vmem [shape: f32[2,256], index: 1, kind: input, shape index: {}]   ;;  %s335_s2 = inlined_call_operand.vmem [shape: f32[1,256], index: 2, kind: output, shape index: {}]  }
   0x1 LB: > { %s228_s10 = sadd.s32 4294967295, %s284_s9   ;;  %p230_p0 = scmp.ge.s32.totalorder %s284_s9, 1  ;;  %s284_s9 = sphi %s302_s9, %s13_s9  }
   0x2   : > { %p91_p1 = scmp.lt.s32.totalorder %s284_s9, 3  ;;  %s104_s13 = sshll.u32 %s333_s0, 4  ;;  %s105_s13 = int_to_ptr.vmem [resolvable:$true] %s104_s13 }
   0x3   : > { %p248_p3 = scmp.eq.s32.totalorder %s228_s10, 0  ;;  %s259_s15 = scalar_lea.vmem %s105_s13, 16 }
   0x4   : > { %p313_p2 = pnand %p230_p0, %p91_p1  ;;  %p260_p6 = scmp.ne.s32.totalorder %s105_s13, %s259_s15 }
   0x5   : > { %p267_p10 = scmp.lt.s32.totalorder %s105_s13, %s105_s13  ;;  %p268_p11 = scmp.lt.s32.totalorder %s259_s15, %s259_s15 }
   0x6   : > { %p244_p4 = pneg %p313_p2 }
   0x7   : > { %p269_p12 = por %p268_p11, %p267_p10 }
   0x8   : > { %p245_p5 = pnand %p248_p3, %p244_p4 }
   0xa   : > { %p261_p7 = pneg %p245_p5 }
   0xc   : > { %p262_p8 = pnand %p261_p7, %p260_p6 }
   0xe   : > { %p263_p9 = pneg %p262_p8 }
  0x10   : > { %p270_p13 = pnand %p269_p12, %p263_p9 }
  0x12   : > { %273 = shalt.err (!%p270_p13)
}
  0x13   : > { %s286_s16 = smov [#allocation2]   ;;  %124 = sbr.rel (%p313_p2) target bundleno = 47 (0x2f), region = 28 }
  0x14   : > { %247 = dma.vmem_to_smem (!%p245_p5), %s105_s13, 16, %s286_s16, [#allocation3]  }
  0x18   : > { %279 = dma.done.wait (%p248_p3), [#allocation3], 16  }
  0x19   : > { %281 = vsyncadd (%p248_p3), [#allocation3], 4294967280 }
  0x1a   : > { %130 = sfence }
  0x1b   : > { %p144_p0 = scmp.lt.s32.totalorder %s228_s10, 1  ;;  %s151_s17 = sld [smem:[#allocation2]] }
  0x1c   : > { %s236_s18 = sld [smem:[#allocation2 + $0x1]] }
  0x1d   : > { %s338_s10 = smov (!%p144_p0, %s228_s10), 1  ;;  %s237_s19 = sld [smem:[#allocation2 + $0x2]] }
  0x1e   : > { %s235_s20 = sshll.u32 %s338_s10, 1  ;;  %s150_s26 = scalar_lea.vmem %s335_s2, %s338_s10 }
  0x1f   : > { %s147_s23 = scalar_lea.vmem %s334_s1, %s235_s20 }
  0x20   : > { %v154_v0 = vld [vmem:[%s147_s23] sm:$0x3] }
  0x21   : > { %v155_v1 = vstv %s151_s17 }
  0x22   : > { %v157_v2 = vstv %s236_s18  ;;  %v156_v3 = vmul.f32 %v155_v1, %v154_v0 }
  0x23   : > { %v158_v4 = vmul.f32 %v157_v2, %v154_v0  ;;  %v163_v6 = vstv %s237_s19 }
  0x25   : > { %v160_v5 = vrot.slane %v158_v4, 1 }
  0x27   : > { %v162_v7 = vadd.f32 %v160_v5, %v156_v3 }
  0x29   : > { %v164_v8 = vadd.f32 %v163_v6, %v162_v7 }
  0x2b   : > { %vm165_vm0 = vcmp.ge.f32.partialorder %v164_v8, 0.0  ;;  %v166_v9 = vmul.f32 0.01, %v164_v8 }
  0x2d   : > { %v167_v10 = vsel %vm165_vm0, %v164_v8, %v166_v9 }
  0x2e   : > { %168 = vst [vmem:[%s150_s26] sm:$0x1] %v167_v10 }
  0x2f PF: > { %s13_s9 = sadd.s32 1, %s284_s9  }
  0x30   : > { %p10_p1 = scmp.ge.s32.totalorder %s13_s9, 4  }
  0x32   :  { %12 = sbr.rel (!%p10_p1) target bundleno = 1 (0x1), region = 63 }
  0x37   :  { %186 = vsyncpa [#allocation3], 1 }
  0x38   :  { %188 = vsyncpa [#allocation3 + $0x1], 1 }

</bundles_post_ra>
